<compile_context>
chip_gen: v7x
topology: tpu7x:2x2x1
jax: 0.10.0
libtpu: 0.0.40
codegen_flags: <defaults>
</compile_context>

<pallas_src>
import functools

import jax
import jax.numpy as jnp
from jax import lax
from jax.experimental import pallas as pl
from jax.experimental.pallas import tpu as pltpu


def _write_partials(i, tm, n_rows, ce, msk, loss_ref, msum_ref):
    """Mask ragged rows, reduce to scalars, store into lane (0,0) of (8,128) tiles."""
    row = i * tm + lax.broadcasted_iota(jnp.int32, (tm, 1), 0)
    valid = row < n_rows
    part_loss = jnp.sum(jnp.where(valid, ce * msk, 0.0), keepdims=True)
    part_mask = jnp.sum(jnp.where(valid, msk, 0.0), keepdims=True)
    r8 = lax.broadcasted_iota(jnp.int32, (8, 128), 0)
    c128 = lax.broadcasted_iota(jnp.int32, (8, 128), 1)
    one_hot = ((r8 == 0) & (c128 == 0)).astype(jnp.float32)
    loss_ref[...] = one_hot * part_loss
    msum_ref[...] = one_hot * part_mask


def _mce_single_block_kernel(logits_ref, tgt_ref, msk_ref, loss_ref, msum_ref,
                             *, n_rows):
    """1-D grid over row blocks; the whole vocab sits in one block (nj == 1)."""
    i = pl.program_id(0)
    tm, tv = logits_ref.shape

    raw = logits_ref[...]                                   # native dtype (bf16 ok)
    col = lax.broadcasted_iota(jnp.int32, (tm, tv), 1)      # local lane ids
    hit = col == tgt_ref[...]                               # (tm, tv) bool

    # Target logit: exact in the raw dtype (exactly one element selected per row).
    tl = jnp.sum(jnp.where(hit, raw, 0), axis=-1, keepdims=True).astype(jnp.float32)

    # Logsumexp path in f32.
    logits = raw.astype(jnp.float32)
    m = jnp.max(logits, axis=-1, keepdims=True)
    s = jnp.sum(jnp.exp(logits - m), axis=-1, keepdims=True)
    ce = (jnp.log(s) + m) - tl                              # (tm, 1)

    _write_partials(i, tm, n_rows, ce, msk_ref[...], loss_ref, msum_ref)


def _mce_streaming_kernel(logits_ref, tgt_ref, msk_ref, loss_ref, msum_ref,
                          m_sc, s_sc, tl_sc, *, n_rows, vocab, ragged_v):
    """2-D grid (row blocks [parallel], vocab blocks [arbitrary reduction, last])."""
    i = pl.program_id(0)
    j = pl.program_id(1)
    nj = pl.num_programs(1)
    tm, tv = logits_ref.shape

    @pl.when(j == 0)
    def _():
        m_sc[...] = jnp.full_like(m_sc, -jnp.inf)
        s_sc[...] = jnp.zeros_like(s_sc)
        tl_sc[...] = jnp.zeros_like(tl_sc)

    raw = logits_ref[...]                                   # native dtype
    col = lax.broadcasted_iota(jnp.int32, (tm, tv), 1)      # LOCAL lane ids
    tgt_local = tgt_ref[...] - j * tv                       # (tm, 1) per-row shift

    # Target-logit accumulation on the raw dtype (exact: one element per row;
    # out-of-range / ragged columns can never match a valid shifted target).
    tl_sc[...] = tl_sc[...] + jnp.sum(
        jnp.where(col == tgt_local, raw, 0), axis=-1, keepdims=True
    ).astype(jnp.float32)

    logits = raw.astype(jnp.float32)
    if ragged_v:
        # Only compiled in when no 128-multiple divisor of V exists: mask the
        # tail of the last vocab block so it never reaches the logsumexp.
        limit = vocab - j * tv
        logits = jnp.where(col < limit, logits, -jnp.inf)

    # Online logsumexp update along the vocab axis.
    blk_max = jnp.max(logits, axis=-1, keepdims=True)
    m_new = jnp.maximum(m_sc[...], blk_max)
    s_sc[...] = (s_sc[...] * jnp.exp(m_sc[...] - m_new)
                 + jnp.sum(jnp.exp(logits - m_new), axis=-1, keepdims=True))
    m_sc[...] = m_new

    @pl.when(j == nj - 1)
    def _():
        ce = (jnp.log(s_sc[...]) + m_sc[...]) - tl_sc[...]
        _write_partials(i, tm, n_rows, ce, msk_ref[...], loss_ref, msum_ref)


def _choose_tiles(n_rows, vocab, itemsize):
    """Pick (tm, tv): ~8 MiB of logits per buffer (double-buffered ~16 MiB)."""
    budget = 8 * 1024 * 1024                    # bytes per logits buffer
    max_tm = 2048

    # Prefer a single vocab block: possible whenever >= 8 full rows fit the budget.
    if vocab * itemsize * 8 <= budget:
        tv = vocab
    else:
        # Largest multiple of 128 that divides V and keeps tm >= 8 rows.
        tv_cap = max(128, ((budget // (8 * itemsize)) // 128) * 128)
        tv = None
        d = tv_cap
        while d >= 128:
            if vocab % d == 0:
                tv = d
                break
            d -= 128
        if tv is None:
            tv = min(2048, tv_cap)              # fallback: ragged last vocab block

    tm = budget // max(1, tv * itemsize)
    tm = max(8, min(int(tm), max_tm))
    rows8 = ((n_rows + 7) // 8) * 8
    tm = min(tm, rows8)                         # don't over-allocate for tiny N
    if rows8 >= 16:
        # Keep >= 2 row blocks so both v7x TensorCores get work (no-op on 1-TC chips).
        half = ((((n_rows + 1) // 2) + 7) // 8) * 8
        tm = min(tm, half)
    tm = max(8, (tm // 8) * 8)                  # sublane-aligned
    return tm, tv


def mask_cross_entropy_loss(outputs, targets, mask, *,
                            tile_rows=None, tile_vocab=None):
    """outputs: (B, T, V) float (f32 or bf16); targets: (B, T) int; mask: (B, T)."""
    B, T, V = outputs.shape
    N = B * T

    logits = outputs.reshape(N, V)                      # keep HBM dtype (bf16 ok)
    tgt = targets.reshape(N, 1).astype(jnp.int32)
    msk = mask.reshape(N, 1).astype(jnp.float32)

    itemsize = jnp.dtype(logits.dtype).itemsize
    auto_tm, auto_tv = _choose_tiles(N, V, itemsize)
    tm = int(tile_rows) if tile_rows is not None else auto_tm
    tv = int(tile_vocab) if tile_vocab is not None else auto_tv
    tv = V if tv >= V else tv

    ni = pl.cdiv(N, tm)
    nj = pl.cdiv(V, tv)

    # VMEM accounting: each (tm,1) column pads its lane dim to 128 (tm*512 B).
    pad_col = tm * 128 * 4
    vmem_limit = (2 * tm * tv * itemsize        # double-buffered logits tiles
                  + 4 * pad_col                 # tgt + msk, double-buffered
                  + 3 * pad_col                 # online-LSE scratch (streaming path)
                  + 4 * 8 * 128 * 4             # double-buffered (8,128) partials
                  + (2 << 20))                  # headroom
    vmem_limit = int(min(max(vmem_limit, 32 << 20), 48 << 20))  # v7x-safe clamp

    out_shape = (jax.ShapeDtypeStruct((ni * 8, 128), jnp.float32),
                 jax.ShapeDtypeStruct((ni * 8, 128), jnp.float32))
    cost = pl.CostEstimate(
        flops=int(5 * N * V),
        transcendentals=int(N * V),
        bytes_accessed=int(N * V * itemsize + N * 8 + ni * 8 * 128 * 8))

    if nj == 1:
        kernel = functools.partial(_mce_single_block_kernel, n_rows=N)
        part_loss, part_mask = pl.pallas_call(
            kernel,
            out_shape=out_shape,
            grid_spec=pltpu.PrefetchScalarGridSpec(
                num_scalar_prefetch=0,
                grid=(ni,),
                in_specs=[
                    pl.BlockSpec((tm, tv), lambda i: (i, 0)),
                    pl.BlockSpec((tm, 1), lambda i: (i, 0)),
                    pl.BlockSpec((tm, 1), lambda i: (i, 0)),
                ],
                out_specs=(
                    pl.BlockSpec((8, 128), lambda i: (i, 0)),
                    pl.BlockSpec((8, 128), lambda i: (i, 0)),
                ),
            ),
            compiler_params=pltpu.CompilerParams(
                dimension_semantics=("parallel",),
                vmem_limit_bytes=vmem_limit),
            cost_estimate=cost,
        )(logits, tgt, msk)
    else:
        kernel = functools.partial(_mce_streaming_kernel, n_rows=N, vocab=V,
                                   ragged_v=(V % tv != 0))
        part_loss, part_mask = pl.pallas_call(
            kernel,
            out_shape=out_shape,
            grid_spec=pltpu.PrefetchScalarGridSpec(
                num_scalar_prefetch=0,
                grid=(ni, nj),                           # vocab reduction last
                in_specs=[
                    pl.BlockSpec((tm, tv), lambda i, j: (i, j)),
                    pl.BlockSpec((tm, 1), lambda i, j: (i, 0)),
                    pl.BlockSpec((tm, 1), lambda i, j: (i, 0)),
                ],
                out_specs=(
                    pl.BlockSpec((8, 128), lambda i, j: (i, 0)),
                    pl.BlockSpec((8, 128), lambda i, j: (i, 0)),
                ),
                scratch_shapes=[
                    pltpu.VMEM((tm, 1), jnp.float32),    # running max  m
                    pltpu.VMEM((tm, 1), jnp.float32),    # running sum  s
                    pltpu.VMEM((tm, 1), jnp.float32),    # target-logit accumulator
                ],
            ),
            compiler_params=pltpu.CompilerParams(
                dimension_semantics=("parallel", "arbitrary"),
                vmem_limit_bytes=vmem_limit),
            cost_estimate=cost,
        )(logits, tgt, msk)

    # Matches PyTorch: NaN/Inf if sum(mask) == 0.
    return jnp.sum(part_loss) / jnp.sum(part_mask)


def _reference(outputs, targets, mask):
    N, V = outputs.shape[0] * outputs.shape[1], outputs.shape[2]
    logits = outputs.reshape(N, V).astype(jnp.float32)
    tgt = targets.reshape(N)
    msk = mask.reshape(N).astype(jnp.float32)
    logp = jax.nn.log_softmax(logits, axis=-1)
    ce = -jnp.take_along_axis(logp, tgt[:, None], axis=-1)[:, 0]
    return jnp.sum(ce * msk) / jnp.sum(msk)


if __name__ == "__main__":
    root = jax.random.PRNGKey(0)

    def make(B, T, V, key, dtype=jnp.float32):
        k1, k2, k3 = jax.random.split(key, 3)
        outputs = jax.random.normal(k1, (B, T, V), dtype=jnp.float32).astype(dtype)
        targets = jax.random.randint(k2, (B, T), 0, V, dtype=jnp.int32)
        mask = (jax.random.uniform(k3, (B, T)) > 0.3).astype(jnp.float32)
        return outputs, targets, mask

    def check(B, T, V, key, dtype=jnp.float32, tol=1e-5, **kw):
        o, t, m = make(B, T, V, key, dtype)
        loss = jax.block_until_ready(mask_cross_entropy_loss(o, t, m, **kw))
        ref = _reference(o, t, m)
        assert jnp.allclose(loss, ref, rtol=tol, atol=tol), (B, T, V, loss, ref)

    # 1) small, exactly tiled case (spec-sized example; single vocab block).
    check(2, 8, 128, jax.random.fold_in(root, 0))
    # 2) ragged rows (N=14), non-128-multiple vocab as one full block.
    check(2, 7, 200, jax.random.fold_in(root, 1))
    # 3) larger non-128-multiple vocab, still a single full block.
    check(2, 3, 8448, jax.random.fold_in(root, 2))
    # 4) streaming path: multiple row + vocab blocks, tv divides V (no tail mask).
    check(4, 12, 256, jax.random.fold_in(root, 3), tile_rows=16, tile_vocab=128)
    # 5) streaming path with ragged last vocab block (fallback tail mask).
    check(2, 5, 200, jax.random.fold_in(root, 4), tile_rows=8, tile_vocab=128)
    # 6) bf16 logits (target-logit select stays in bf16; LSE path in f32).
    check(2, 8, 256, jax.random.fold_in(root, 5), dtype=jnp.bfloat16, tol=1e-4)

    print("KERNEL_OK")
</pallas_src>

<mosaic_0001>
module attributes {stable_mosaic.version = 11 : i64} {
  func.func @_mce_single_block_kernel(%arg0: i32, %arg1: memref<8x128xf32, #tpu.memory_space<vmem>>, %arg2: memref<8x1xi32, #tpu.memory_space<vmem>>, %arg3: memref<8x1xf32, #tpu.memory_space<vmem>>, %arg4: memref<8x128xf32, #tpu.memory_space<vmem>>, %arg5: memref<8x128xf32, #tpu.memory_space<vmem>>) attributes {dimension_semantics = [#tpu.dimension_semantics<parallel>], iteration_bounds = array<i64: 2>, scalar_prefetch = 0 : i64, scratch_operands = 0 : i64, tpu.core_type = #tpu.core_type<tc>, window_params = [{transform_indices = @transform_0, window_bounds = array<i64: 8, 128>}, {transform_indices = @transform_1, window_bounds = array<i64: 8, 1>}, {transform_indices = @transform_2, window_bounds = array<i64: 8, 1>}, {transform_indices = @transform_3, window_bounds = array<i64: 8, 128>}, {transform_indices = @transform_4, window_bounds = array<i64: 8, 128>}]} {
    %c0 = arith.constant 0 : index
    %c0_0 = arith.constant 0 : index
    %0 = vector.load %arg1[%c0, %c0_0] : memref<8x128xf32, #tpu.memory_space<vmem>>, vector<8x128xf32>
    %1 = tpu.iota {dimensions = array<i32: 1>} : vector<8x128xi32>
    %c0_1 = arith.constant 0 : index
    %c0_2 = arith.constant 0 : index
    %2 = vector.load %arg2[%c0_1, %c0_2] : memref<8x1xi32, #tpu.memory_space<vmem>>, vector<8x1xi32>
    %3 = vector.broadcast %2 : vector<8x1xi32> to vector<8x128xi32>
    %4 = arith.cmpi eq, %1, %3 : vector<8x128xi32>
    %c0_i32 = arith.constant 0 : i32
    %5 = arith.sitofp %c0_i32 : i32 to f32
    %6 = vector.broadcast %5 : f32 to vector<8x128xf32>
    %7 = arith.select %4, %0, %6 : vector<8x128xi1>, vector<8x128xf32>
    %cst = arith.constant dense<0.000000e+00> : vector<8xf32>
    %8 = vector.multi_reduction <add>, %7, %cst [1] : vector<8x128xf32> to vector<8xf32>
    %9 = vector.shape_cast %8 : vector<8xf32> to vector<8x1xf32>
    %cst_3 = arith.constant dense<0xFF800000> : vector<8xf32>
    %10 = vector.multi_reduction <maximumf>, %0, %cst_3 [1] : vector<8x128xf32> to vector<8xf32>
    %11 = vector.shape_cast %10 : vector<8xf32> to vector<8x1xf32>
    %12 = vector.broadcast %11 : vector<8x1xf32> to vector<8x128xf32>
    %13 = arith.subf %0, %12 : vector<8x128xf32>
    %14 = math.exp %13 : vector<8x128xf32>
    %cst_4 = arith.constant dense<0.000000e+00> : vector<8xf32>
    %15 = vector.multi_reduction <add>, %14, %cst_4 [1] : vector<8x128xf32> to vector<8xf32>
    %16 = vector.shape_cast %15 : vector<8xf32> to vector<8x1xf32>
    %17 = math.log %16 : vector<8x1xf32>
    %18 = arith.addf %17, %11 : vector<8x1xf32>
    %19 = arith.subf %18, %9 : vector<8x1xf32>
    %c0_5 = arith.constant 0 : index
    %c0_6 = arith.constant 0 : index
    %20 = vector.load %arg3[%c0_5, %c0_6] : memref<8x1xf32, #tpu.memory_space<vmem>>, vector<8x1xf32>
    %c8_i32 = arith.constant 8 : i32
    %21 = arith.muli %arg0, %c8_i32 : i32
    %22 = tpu.iota {dimensions = array<i32: 0>} : vector<8x1xi32>
    %23 = vector.broadcast %21 : i32 to vector<8x1xi32>
    %24 = arith.addi %23, %22 : vector<8x1xi32>
    %c16_i32 = arith.constant 16 : i32
    %25 = vector.broadcast %c16_i32 : i32 to vector<8x1xi32>
    %26 = arith.cmpi slt, %24, %25 : vector<8x1xi32>
    %27 = arith.mulf %19, %20 : vector<8x1xf32>
    %cst_7 = arith.constant 0.000000e+00 : f32
    %28 = vector.broadcast %cst_7 : f32 to vector<8x1xf32>
    %29 = arith.select %26, %27, %28 : vector<8x1xi1>, vector<8x1xf32>
    %30 = vector.shape_cast %29 : vector<8x1xf32> to vector<1x8x1xf32>
    %cst_8 = arith.constant dense<0.000000e+00> : vector<1xf32>
    %31 = vector.multi_reduction <add>, %30, %cst_8 [1, 2] : vector<1x8x1xf32> to vector<1xf32>
    %32 = vector.shape_cast %31 : vector<1xf32> to vector<1x1x1xf32>
    %33 = vector.extract %32[0, 0, 0] : f32 from vector<1x1x1xf32>
    %34 = vector.broadcast %33 : f32 to vector<1x1xf32>
    %cst_9 = arith.constant 0.000000e+00 : f32
    %35 = vector.broadcast %cst_9 : f32 to vector<8x1xf32>
    %36 = arith.select %26, %20, %35 : vector<8x1xi1>, vector<8x1xf32>
    %37 = vector.shape_cast %36 : vector<8x1xf32> to vector<1x8x1xf32>
    %cst_10 = arith.constant dense<0.000000e+00> : vector<1xf32>
    %38 = vector.multi_reduction <add>, %37, %cst_10 [1, 2] : vector<1x8x1xf32> to vector<1xf32>
    %39 = vector.shape_cast %38 : vector<1xf32> to vector<1x1x1xf32>
    %40 = vector.extract %39[0, 0, 0] : f32 from vector<1x1x1xf32>
    %41 = vector.broadcast %40 : f32 to vector<1x1xf32>
    %42 = tpu.iota {dimensions = array<i32: 0>} : vector<8x128xi32>
    %43 = tpu.iota {dimensions = array<i32: 1>} : vector<8x128xi32>
    %c0_i32_11 = arith.constant 0 : i32
    %44 = vector.broadcast %c0_i32_11 : i32 to vector<8x128xi32>
    %45 = arith.cmpi eq, %42, %44 : vector<8x128xi32>
    %c0_i32_12 = arith.constant 0 : i32
    %46 = vector.broadcast %c0_i32_12 : i32 to vector<8x128xi32>
    %47 = arith.cmpi eq, %43, %46 : vector<8x128xi32>
    %48 = arith.andi %45, %47 : vector<8x128xi1>
    %49 = arith.extui %48 : vector<8x128xi1> to vector<8x128xi32>
    %50 = arith.sitofp %49 : vector<8x128xi32> to vector<8x128xf32>
    %51 = vector.broadcast %34 : vector<1x1xf32> to vector<8x128xf32>
    %52 = arith.mulf %50, %51 : vector<8x128xf32>
    %c0_13 = arith.constant 0 : index
    %c0_14 = arith.constant 0 : index
    %53 = vector.load %arg4[%c0_13, %c0_14] : memref<8x128xf32, #tpu.memory_space<vmem>>, vector<8x128xf32>
    tpu.vector_store %arg4[%c0_13, %c0_14], %52 {strides = array<i32>} : memref<8x128xf32, #tpu.memory_space<vmem>>, vector<8x128xf32>,
    %54 = vector.broadcast %41 : vector<1x1xf32> to vector<8x128xf32>
    %55 = arith.mulf %50, %54 : vector<8x128xf32>
    %c0_15 = arith.constant 0 : index
    %c0_16 = arith.constant 0 : index
    %56 = vector.load %arg5[%c0_15, %c0_16] : memref<8x128xf32, #tpu.memory_space<vmem>>, vector<8x128xf32>
    tpu.vector_store %arg5[%c0_15, %c0_16], %55 {strides = array<i32>} : memref<8x128xf32, #tpu.memory_space<vmem>>, vector<8x128xf32>,
    return
  }
  func.func @transform_0(%arg0: i32) -> (i32, i32) {
    %c0_i32 = arith.constant 0 : i32
    %c0_i32_0 = arith.constant 0 : i32
    return %arg0, %c0_i32 : i32, i32
  }
  func.func @transform_1(%arg0: i32) -> (i32, i32) {
    %c0_i32 = arith.constant 0 : i32
    %c0_i32_0 = arith.constant 0 : i32
    return %arg0, %c0_i32 : i32, i32
  }
  func.func @transform_2(%arg0: i32) -> (i32, i32) {
    %c0_i32 = arith.constant 0 : i32
    %c0_i32_0 = arith.constant 0 : i32
    return %arg0, %c0_i32 : i32, i32
  }
  func.func @transform_3(%arg0: i32) -> (i32, i32) {
    %c0_i32 = arith.constant 0 : i32
    %c0_i32_0 = arith.constant 0 : i32
    return %arg0, %c0_i32 : i32, i32
  }
  func.func @transform_4(%arg0: i32) -> (i32, i32) {
    %c0_i32 = arith.constant 0 : i32
    %c0_i32_0 = arith.constant 0 : i32
    return %arg0, %c0_i32 : i32, i32
  }
}

</mosaic_0001>

<bundles_post_ra>
// kernel: tpu_custom_call.1
= control target key start
LH: loop header
LB: loop body
LE: loop exit
PB: predicated region body
PF: predicated region fallthrough
CT: control target
= control target key end

     0   :  { %10 = vsyncpa [#allocation3], 0  ;;  %s804_s0 = inlined_call_operand.vmem [shape: f32[16,128], index: 0, kind: input, shape index: {}]   ;;  %s805_s1 = inlined_call_operand.vmem [shape: s32[16,1], index: 1, kind: input, shape index: {}]   ;;  %s806_s2 = inlined_call_operand.vmem [shape: f32[16,1], index: 2, kind: input, shape index: {}]   ;;  %s807_s3 = inlined_call_operand.hbm [shape: f32[16,128], index: 3, kind: output, shape index: {0}]   ;;  %s808_s4 = inlined_call_operand.hbm [shape: f32[16,128], index: 4, kind: output, shape index: {1}]  }
   0x1   :  { %12 = vsyncpa [#allocation3 + $0x1], 0 }
   0x2   :  { %13 = vsyncpa [#allocation5], 0 }
   0x3   :  { %15 = vsyncpa [#allocation5 + $0x1], 0  ;;  %s646_s15 = smov 0   ;;  %s648_s16 = smov 0  }
   0x4   :  { %s650_s17 = smov 0   ;;  %s652_s18 = smov 0  }
   0x5 LB: > { %s667_s19 = sadd.s32 4294967295, %s615_s18   ;;  %s449_s20 = sadd.s32 4294967294, %s615_s18   ;;  %s615_s18 = sphi %s652_s18, %s814_s18   ;;  %s611_s17 = sphi %s650_s17, %s813_s17   ;;  %s607_s16 = sphi %s648_s16, %s812_s16   ;;  %s603_s15 = sphi %s646_s15, %s811_s15  }
   0x6   : > { %s671_s21 = sadd.s32 1, %s615_s18   ;;  %s106_s22 = sadd.s32 1, %s611_s17 }
   0x7   : > { %s103_s23 = ssub.s32 %s615_s18, %s671_s21  ;;  %p116_p0 = scmp.ne.s32.totalorder %s611_s17, %s607_s16 }
   0x8   : > { %p104_p1 = scmp.eq.s32.totalorder %s103_s23, 0  ;;  %p117_p2 = scmp.eq.s32.totalorder %s667_s19, 1 }
   0x9   : > { %p122_p3 = scmp.ne.s32.totalorder %s607_s16, %s603_s15  ;;  %p123_p4 = scmp.eq.s32.totalorder %s449_s20, 1 }
   0xa   : > { %s682_s24 = scalar_select %p104_p1, %s611_s17, %s106_s22  }
   0xb   : > { %p684_p5 = por %p117_p2, %p116_p0  ;;  %p688_p6 = por %p123_p4, %p122_p3 }
   0xc   : > { %p452_p7 = scmp.ge.s32.totalorder %s615_s18, 1  ;;  %p188_p8 = scmp.lt.s32.totalorder %s615_s18, 3 }
   0xe   : > { %p189_p9 = pnand %p452_p7, %p188_p8 }
   0xf   : > { %p226_p10 = scmp.lt.s32.totalorder (!%p189_p9), %s667_s19, 1  ;;  %v617_v0 = vmov (!%p189_p9), 0   ;;  %v239_v6 = vlaneseq (!%p189_p9)  ;;  %s458_s9 = sshll.u32 (!%p189_p9), %s667_s19, 3  ;;  %vm269_vm2 = vcmask (!%p189_p9), 7168   ;;  %v618_v40 = vmov (!%p189_p9), 0.0  }
  0x10   : > { %192 = sbr.rel (%p189_p9) target bundleno = 593 (0x251), region = 32  ;;  %516 = vset.pattern.permute.xlu0 (!%p189_p9), %v617_v0  ;;  %v264_v13 = vstv (!%p189_p9), %s458_s9  ;;  %s712_s13 = sand.u32 (!%p189_p9), 1, %s607_s16  }
  0x11   : > { %v240_v7 = vand.u32 (!%p189_p9), 127, %v239_v6  ;;  %v263_v12 = vshrl.u32 (!%p189_p9), %v239_v6, 7  ;;  %s453_s14 = sshll.u32 (!%p189_p9), %s712_s13, 3  ;;  %s462_s20 = sshll.u32 (!%p189_p9), %s667_s19, 7 }
  0x12   : > { %s218_s22 = scalar_lea.vmem (!%p189_p9), [#allocation2], %s453_s14  ;;  %s721_s30 = scalar_lea.hbm (!%p189_p9), %s807_s3, %s462_s20 }
  0x13   : > { %v265_v17 = vadd.s32 (!%p189_p9), %v264_v13, %v263_v12  ;;  %vm291_vm3 = vcmp.eq.s32.totalorder (!%p189_p9), %v263_v12, 0  ;;  %vm292_vm4 = vcmp.eq.s32.totalorder (!%p189_p9), %v240_v7, 0  ;;  %s321_s23 = sshll.u32 (!%p189_p9), %s218_s22, 4  ;;  %s619_s10 = smov (!%p189_p9), [#allocation2]   ;;  %s723_s23 = int_to_ptr.vmem [resolvable:$true] %s321_s23 }
  0x14   : > { %vm293_vm5 = vmand (!%p189_p9), %vm291_vm3, %vm292_vm4  ;;  %s521_s9 = scalar_lea.vmem (!%p189_p9), %s723_s23, 128  ;;  %s525_s11 = sshll.u32 (!%p189_p9), %s619_s10, 4  ;;  %s526_s11 = int_to_ptr.vmem [resolvable:$false] %s525_s11 }
  0x15   : > { %vm266_vm1 = vcmp.lt.s32.totalorder (!%p189_p9), %v265_v17, 16  ;;  %v459_v41 = vsel (!%p189_p9), %vm293_vm5, 1.0, %v618_v40  ;;  %p522_p11 = scmp.ne.s32.totalorder (!%p189_p9), %s723_s23, %s521_s9  ;;  %p528_p0 = scmp.lt.s32.totalorder (!%p189_p9), %s723_s23, %s526_s11 }
  0x17   : > { %s227_s27 = scalar_select %p226_p10, %s667_s19, 1 }
  0x18   : > { %p523_p12 = pnand %p522_p11, %p684_p5 }
  0x19   : > { %s696_s28 = sshll.u32 %s227_s27, 3 }
  0x1a   : > { %s229_s5 = scalar_lea.vmem %s804_s0, %s696_s28  ;;  %s233_s8 = scalar_lea.vmem %s805_s1, %s696_s28 }
  0x1b   : > { %v238_v1 = vld [vmem:[%s229_s5] sm:$0xff]  ;;  %s237_s12 = scalar_lea.vmem %s806_s2, %s696_s28  ;;  %s725_s5 = scalar_lea.vmem [#allocation4], %s453_s14 }
  0x1c   : > { %249 = vmax.xlane.f32.xlu0 %v238_v1  ;;  %v241_v2 = vld [vmem:[%s233_s8] sm:$0xff]  ;;  %s334_s6 = sshll.u32 %s725_s5, 4  ;;  %s303_s8 = scalar_lea.sflag [#allocation3], %s712_s13  ;;  %s762_s6 = int_to_ptr.vmem [resolvable:$true] %s334_s6 }
  0x1d   : > { %v260_v19 = vld [vmem:[%s237_s12] sm:$0xff]  ;;  %p524_p13 = pneg %p523_p12  ;;  %s527_s12 = scalar_lea.vmem %s526_s11, 256 }
  0x1e   : > { %v280_v23 = vsel %vm266_vm1, %v260_v19, 0.0  ;;  %p529_p1 = scmp.lt.s32.totalorder %s527_s12, %s521_s9 }
  0x1f   : > { %v281_v25 = vsel %vm269_vm2, %v280_v23, 0.0 }
  0x20   : > { %p530_p2 = por %p529_p1, %p528_p0 }
  0x22   : > { %p531_p3 = pnand %p530_p2, %p524_p13 }
  0x32   : > { %243 = vperm.xlu0 %516, %v241_v2  }
  0xa9   : > { %v250_v3 = vpop.xlane.xlu0 %249 }
  0xaa   : > { %v251_v4 = vsub.f32 %v238_v1, %v250_v3 }
  0xac   : > { %v252_v5 = vmul.f32 1.442695, %v251_v4 }
  0xae   : > { %517 = vpow2.f32 %v252_v5 }
  0xb1   : > { %v244_v8 = vpop.permute.xlu0 %243 }
  0xb2   : > { %vm245_vm0 = vcmp.eq.s32.totalorder %v240_v7, %v244_v8 }
  0xb3   : > { %v246_v10 = vsel %vm245_vm0, %v238_v1, 0.0 }
  0xb8   : > { %v518_v9 = vpop.eup %517 }
  0xb9   : > { %254 = vadd.xlane.f32.xlu1 %v518_v9 }
  0xbd   : > { %247 = vadd.xlane.f32.xlu1 %v246_v10 }
 0x146   : > { %v255_v11 = vpop.xlane.xlu1 %254 }
 0x147   : > { %519 = vlog2.f32 %v255_v11 }
 0x14a   : > { %v248_v16 = vpop.xlane.xlu1 %247 }
 0x151   : > { %v520_v14 = vpop.eup %519 }
 0x152   : > { %v257_v15 = vmul.f32 0.6931472, %v520_v14 }
 0x154   : > { %v258_v18 = vadd.f32 %v257_v15, %v250_v3 }
 0x156   : > { %v259_v20 = vsub.f32 %v258_v18, %v248_v16 }
 0x158   : > { %v267_v21 = vmul.f32 %v260_v19, %v259_v20 }
 0x15a   : > { %v268_v22 = vsel %vm266_vm1, %v267_v21, 0.0 }
 0x15b   : > { %v270_v24 = vsel %vm269_vm2, %v268_v22, 0.0 }
 0x15c   : > { %271 = vadd.xlane.f32.xlu1 %v270_v24 }
 0x160   : > { %282 = vadd.xlane.f32.xlu1 %v281_v25 }
 0x1e9   : > { %v272_v26 = vpop.xlane.xlu1 %271 }
 0x1ea   : > { %v273_v27 = vrot.slane %v272_v26, 4 }
 0x1ec   : > { %v274_v28 = vadd.f32 %v273_v27, %v272_v26 }
 0x1ed   : > { %v283_v29 = vpop.xlane.xlu1 %282 }
 0x1ee   : > { %v275_v30 = vrot.slane %v274_v28, 2  ;;  %v284_v31 = vrot.slane %v283_v29, 4 }
 0x1f0   : > { %v285_v32 = vadd.f32 %v284_v31, %v283_v29  ;;  %v276_v33 = vadd.f32 %v275_v30, %v274_v28 }
 0x1f2   : > { %v286_v34 = vrot.slane %v285_v32, 2  ;;  %v277_v35 = vrot.slane %v276_v33, 1 }
 0x1f4   : > { %v287_v36 = vadd.f32 %v286_v34, %v285_v32  ;;  %v278_v37 = vadd.f32 %v277_v35, %v276_v33 }
 0x1f6   : > { %466 = vpush %v278_v37  ;;  %v288_v38 = vrot.slane %v287_v36, 1 }
 0x1f8   : > { %v289_v39 = vadd.f32 %v288_v38, %v287_v36 }
 0x1fa   : > { %468 = vpush %v289_v39 }
 0x227   : > { %s467_s27 = spop %466 }
 0x228   : > { %v296_v42 = vstv %s467_s27 }
 0x229   : > { %v297_v43 = vmul.f32 %v459_v41, %v296_v42 }
 0x22b   : > { %s728_s7 = spop %468  ;;  %298 = vst [vmem:[%s218_s22] sm:$0xff] %v297_v43 }
 0x22c   : > { %v299_v44 = vstv %s728_s7 }
 0x22d   : > { %534 = shalt.err (!%p531_p3)
}
 0x22e   : > { %s535_s14 = scalar_lea.hbm %s721_s30, 128  ;;  %s539_s28 = scalar_lea.hbm %s807_s3, 256 }
 0x22f   : > { %p536_p4 = scmp.ne.s32.totalorder %s721_s30, %s535_s14  ;;  %p540_p9 = scmp.lt.u32.totalorder %s721_s30, %s807_s3 }
 0x230   : > { %p541_p10 = scmp.lt.u32.totalorder %s539_s28, %s535_s14  ;;  %p543_p12 = scmp.lt.u32.totalorder %s535_s14, %s721_s30 }
 0x231   : > { %p537_p7 = pnand %p536_p4, %p684_p5 }
 0x232   : > { %p542_p11 = por %p541_p10, %p540_p9 }
 0x233   : > { %p538_p8 = pneg %p537_p7 }
 0x234   : > { %p544_p13 = por %p543_p12, %p542_p11 }
 0x236   : > { %p545_p0 = pnand %p544_p13, %p538_p8 }
 0x238   : > { %548 = shalt.err (!%p545_p0)
}
 0x239   : > { %470 = dma.vmem_to_hbm [thread:$0]  (%p684_p5), %s723_s23, 128, %s721_s30, %s303_s8   ;;  %v300_v45 = vmul.f32 %v459_v41, %v299_v44 }
 0x23a   : > { %s758_s11 = scalar_lea.hbm %s808_s4, %s462_s20  ;;  %s308_s12 = scalar_lea.sflag [#allocation5], %s712_s13 }
 0x23b   : > { %301 = vst [vmem:[%s725_s5] sm:$0xff] %v300_v45  ;;  %s549_s14 = scalar_lea.vmem %s762_s6, 128  ;;  %s620_s23 = smov [#allocation4]  }
 0x23c   : > { %p550_p1 = scmp.ne.s32.totalorder %s762_s6, %s549_s14  ;;  %s553_s19 = sshll.u32 %s620_s23, 4  ;;  %s554_s19 = int_to_ptr.vmem [resolvable:$false] %s553_s19 }
 0x23d   : > { %s555_s30 = scalar_lea.vmem %s554_s19, 256  ;;  %p556_p4 = scmp.lt.s32.totalorder %s762_s6, %s554_s19 }
 0x23e   : > { %p551_p2 = pnand %p550_p1, %p684_p5  ;;  %p557_p7 = scmp.lt.s32.totalorder %s555_s30, %s549_s14 }
 0x240   : > { %p552_p3 = pneg %p551_p2  ;;  %p558_p8 = por %p557_p7, %p556_p4 }
 0x242   : > { %p559_p9 = pnand %p558_p8, %p552_p3 }
 0x244   : > { %562 = shalt.err (!%p559_p9)
}
 0x245   : > { %s563_s13 = scalar_lea.hbm %s758_s11, 128  ;;  %s567_s8 = scalar_lea.hbm %s808_s4, 256 }
 0x246   : > { %p564_p10 = scmp.ne.s32.totalorder %s758_s11, %s563_s13  ;;  %p568_p13 = scmp.lt.u32.totalorder %s758_s11, %s808_s4 }
 0x247   : > { %p569_p0 = scmp.lt.u32.totalorder %s567_s8, %s563_s13  ;;  %p571_p2 = scmp.lt.u32.totalorder %s563_s13, %s758_s11 }
 0x248   : > { %p565_p11 = pnand %p564_p10, %p684_p5 }
 0x249   : > { %p570_p1 = por %p569_p0, %p568_p13 }
 0x24a   : > { %p566_p12 = pneg %p565_p11 }
 0x24b   : > { %p572_p3 = por %p571_p2, %p570_p1 }
 0x24d   : > { %p573_p4 = pnand %p572_p3, %p566_p12 }
 0x24f   : > { %576 = shalt.err (!%p573_p4)
}
 0x250   : > { %471 = dma.vmem_to_hbm [thread:$0]  (%p684_p5), %s762_s6, 128, %s758_s11, %s308_s12  }
 0x251 PF: > { %p481_p7 = scmp.ge.s32.totalorder %s615_s18, 2  ;;  %s346_s28 = sand.u32 1, %s603_s15  }
 0x252   : > { %s347_s29 = scalar_lea.sflag [#allocation3], %s346_s28 }
 0x253   : > { %p475_p8 = pnand %p481_p7, %p688_p6 }
 0x255   : > { %594 = dma.done.wait (!%p475_p8), %s347_s29, 128  }
 0x256   : > { %596 = vsyncadd (!%p475_p8), %s347_s29, 4294967168  ;;  %s356_s7 = scalar_lea.sflag [#allocation5], %s346_s28 }
 0x257   : > { %598 = dma.done.wait (!%p475_p8), %s356_s7, 128  }
 0x258   : > { %600 = vsyncadd (!%p475_p8), %s356_s7, 4294967168  ;;  %p18_p5 = scmp.ge.s32.totalorder %s671_s21, 4   ;;  %s811_s15 = smov %s607_s16 }
 0x259   : > { %s812_s16 = smov %s611_s17  ;;  %s813_s17 = smov %s682_s24 }
 0x25a   : > { %s814_s18 = smov %s671_s21  ;;  %20 = sbr.rel (!%p18_p5) target bundleno = 5 (0x5), region = 90 }
 0x261   :  { %361 = vsyncpa [#allocation3], 1 }
 0x262   :  { %363 = vsyncpa [#allocation3 + $0x1], 1 }
 0x263   :  { %364 = vsyncpa [#allocation5], 1 }
 0x264   :  { %366 = vsyncpa [#allocation5 + $0x1], 1 }

</bundles_post_ra>
